<compile_context>
chip_gen: v7x
topology: tpu7x:2x2x1
jax: 0.10.0
libtpu: 0.0.40
codegen_flags: <defaults>
</compile_context>

<pallas_src>
import math
from functools import partial

import jax
import jax.numpy as jnp
from jax.experimental import pallas as pl
from jax.experimental.pallas import tpu as pltpu


def _embedding_kernel(idx_ref, table_t_ref, out_ref):
    # idx_ref:     (1, TN)  int32   -- lane-dense tile of flattened indices
    # table_t_ref: (D, V)   float32 -- transposed table (grid-invariant block)
    # out_ref:     (D, TN)  float32 -- transposed output tile (lane-dense)
    idx = idx_ref[...]                                     # (1, TN)
    table_t = table_t_ref[...]                             # (D, V)
    v = table_t.shape[1]
    tn = idx.shape[1]
    # Transposed one-hot (V, TN): VPU builds it, MXU consumes it.
    rows = jax.lax.broadcasted_iota(jnp.int32, (v, tn), 0)
    onehot_t = (rows == idx).astype(table_t.dtype)         # (1,TN) bcast over V
    # (D, V) @ (V, TN) -> (D, TN); last dim TN >= 128 -> unmasked stores.
    out_ref[...] = jnp.dot(
        table_t, onehot_t, preferred_element_type=jnp.float32
    ).astype(out_ref.dtype)


@partial(jax.jit, static_argnames=("tile_n",))
def pallas_embedding(x, table_t, *, tile_n=512):
    """Row gather `table[x]` via Pallas.

    x:       integer token indices of any shape
    table_t: (D, V) float32 -- TRANSPOSED embedding table
    returns: x.shape + (D,) float32
    """
    D, V = table_t.shape
    orig_shape = tuple(int(s) for s in x.shape)
    N = 1
    for s in orig_shape:
        N *= s

    # Tile size: multiple of 128 (lane-dense), no larger than needed, capped
    # at the requested tile_n to amortize the ~0.35us per-grid-step overhead.
    tn = max(128, min(int(tile_n), ((N + 127) // 128) * 128))
    tn = ((tn + 127) // 128) * 128
    num_tiles = -(-N // tn)
    Np = num_tiles * tn

    idx_flat = x.reshape(N).astype(jnp.int32)
    if Np != N:
        idx_flat = jnp.pad(idx_flat, (0, Np - N))
    idx2d = idx_flat.reshape(num_tiles, tn)                # (num_tiles, TN)

    # Explicit VMEM budget (double-buffered inputs/outputs + one-hot temp),
    # generous headroom, capped at v7x's 64 MiB physical per TC.
    itemsize = jnp.dtype(table_t.dtype).itemsize
    est = (2 * D * V * itemsize        # table buffers
           + 2 * D * tn * itemsize     # output tile buffers
           + 2 * tn * 4                # index tile buffers
           + V * tn * 4)               # one-hot temporary
    vmem_limit = int(min(max(2 * est + (2 << 20), 16 << 20), 64 << 20))

    out_t = pl.pallas_call(
        _embedding_kernel,
        out_shape=jax.ShapeDtypeStruct((D, Np), table_t.dtype),
        grid=(num_tiles,),
        in_specs=[
            # Lane-dense index tile.
            pl.BlockSpec((1, tn), lambda i: (i, 0)),
            # Grid-invariant table block: constant index_map => the pipeline
            # reuses the same VMEM block every step (no per-step re-DMA).
            # For vocabs too large for VMEM (esp. v7x 64 MiB), switch to a
            # vocab-blocked reduction axis or a scalar-prefetch DMA row gather.
            pl.BlockSpec((D, V), lambda i: (0, 0)),
        ],
        out_specs=pl.BlockSpec((D, tn), lambda i: (0, i)),
        compiler_params=pltpu.CompilerParams(
            dimension_semantics=("parallel",),   # megacore sharding on v7x
            vmem_limit_bytes=vmem_limit,
        ),
    )(idx2d, table_t)

    # Layout plumbing only: drop padding and transpose back to tokens-major.
    out = out_t[:, :N].T                                   # (N, D)
    return out.reshape(orig_shape + (D,))


class MultilingualEmbeddingPallas:
    """JAX/Pallas port of MultilingualEmbedding (forward pass only).

    Notes:
      * padding_idx only zeroes the row at init (F.embedding forward math is
        unchanged by padding_idx); the gradient-masking part is backward-only.
      * Out-of-range / negative indices yield an all-zero output row instead
        of raising, unlike torch.
      * Concatenation order follows dict insertion order, matching
        nn.ParameterDict iteration order in the torch module.
    """

    def __init__(self, id2symbols, dim: int, padding_idx: int = 0, *, key):
        self.id2symbols = id2symbols
        self.dim = dim
        self.padding_idx = padding_idx
        self.tables = {}  # canonical (V, D) parameters (torch layout)
        for symbol_id, v in id2symbols.items():
            if len(v) > 0:
                std = math.sqrt(2.0 / (len(v) + dim))
                val = math.sqrt(3.0) * std
                key, sub = jax.random.split(key)
                w = jax.random.uniform(
                    sub, (len(v), dim), minval=-val, maxval=val,
                    dtype=jnp.float32,
                )
                w = w.at[padding_idx].set(0.0)
                self.tables[f"table-{symbol_id}"] = w

        # Kernel-ready cached layouts, built ONCE (not per forward call):
        # transposed per-language tables and the transposed concatenated table.
        self._tables_t = {k: jnp.asarray(w.T) for k, w in self.tables.items()}
        if self.tables:
            concat = jnp.concatenate(list(self.tables.values()), axis=0)
            self._concat_t = jnp.asarray(concat.T)
        else:
            self._concat_t = None

    def __call__(self, x, symbol_id=None):
        if symbol_id is None:
            return pallas_embedding(x, self._concat_t)
        return pallas_embedding(x, self._tables_t[f"table-{symbol_id}"])


if __name__ == "__main__":
    key = jax.random.PRNGKey(0)

    # Small synthetic symbol sets: "en" has 40 symbols, "zh" has 24, "empty" has 0.
    id2symbols = {
        "en": [f"e{i}" for i in range(40)],
        "zh": [f"z{i}" for i in range(24)],
        "empty": [],
    }
    dim = 32
    key, mkey = jax.random.split(key)
    module = MultilingualEmbeddingPallas(id2symbols, dim, padding_idx=0, key=mkey)

    B, T = 2, 8
    total_vocab = 40 + 24

    # Case 1: symbol_id=None -> lookup into concatenated table.
    key, k1 = jax.random.split(key)
    x_all = jax.random.randint(k1, (B, T), 0, total_vocab, dtype=jnp.int32)
    x_all = x_all.at[0, 0].set(0)  # include the padding index
    out_all = module(x_all)
    out_all = jax.block_until_ready(out_all)

    # Case 2: symbol_id="en" -> lookup into single table.
    key, k2 = jax.random.split(key)
    x_en = jax.random.randint(k2, (B, T), 0, 40, dtype=jnp.int32)
    x_en = x_en.at[1, 3].set(0)
    out_en = module(x_en, symbol_id="en")
    out_en = jax.block_until_ready(out_en)

    # Reference check against plain JAX gather (same semantics as F.embedding fwd).
    concat = jnp.concatenate(list(module.tables.values()), axis=0)
    ref_all = jnp.take(concat, x_all, axis=0)
    ref_en = jnp.take(module.tables["table-en"], x_en, axis=0)

    assert out_all.shape == (B, T, dim) and out_all.dtype == jnp.float32
    assert out_en.shape == (B, T, dim) and out_en.dtype == jnp.float32
    assert jnp.allclose(out_all, ref_all, atol=1e-6)
    assert jnp.allclose(out_en, ref_en, atol=1e-6)
    # Padding row lookups must be exactly zero (row 0 zeroed at init).
    assert jnp.all(out_all[0, 0] == 0.0)
    assert jnp.all(out_en[1, 3] == 0.0)

    print("KERNEL_OK")
</pallas_src>

<mosaic_0001>
module attributes {stable_mosaic.version = 11 : i64} {
  func.func @_embedding_kernel(%arg0: i32, %arg1: memref<1x128xi32, #tpu.memory_space<vmem>>, %arg2: memref<32x64xf32, #tpu.memory_space<vmem>>, %arg3: memref<32x128xf32, #tpu.memory_space<vmem>>) attributes {dimension_semantics = [#tpu.dimension_semantics<parallel>], iteration_bounds = array<i64: 1>, scalar_prefetch = 0 : i64, scratch_operands = 0 : i64, tpu.core_type = #tpu.core_type<tc>, window_params = [{transform_indices = @transform_0, window_bounds = array<i64: 1, 128>}, {pipeline_mode = #tpu.pipeline_mode<synchronous>, transform_indices = @transform_1, window_bounds = array<i64: 32, 64>}, {transform_indices = @transform_2, window_bounds = array<i64: 32, 128>}]} {
    %c0 = arith.constant 0 : index
    %c0_0 = arith.constant 0 : index
    %0 = vector.load %arg1[%c0, %c0_0] : memref<1x128xi32, #tpu.memory_space<vmem>>, vector<1x128xi32>
    %c0_1 = arith.constant 0 : index
    %c0_2 = arith.constant 0 : index
    %1 = vector.load %arg2[%c0_1, %c0_2] : memref<32x64xf32, #tpu.memory_space<vmem>>, vector<32x64xf32>
    %2 = tpu.iota {dimensions = array<i32: 0>} : vector<64x128xi32>
    %3 = vector.broadcast %0 : vector<1x128xi32> to vector<64x128xi32>
    %4 = arith.cmpi eq, %2, %3 : vector<64x128xi32>
    %5 = arith.extui %4 : vector<64x128xi1> to vector<64x128xi32>
    %6 = arith.sitofp %5 : vector<64x128xi32> to vector<64x128xf32>
    %cst = arith.constant dense<0.000000e+00> : vector<32x128xf32>
    %7 = tpu.matmul %1, %6, %cst {dimension_numbers = #tpu.dot_dimension_numbers<[1], [0], [0], [1], [0, 0, 1, 1], [], []>} : vector<32x64xf32>, vector<64x128xf32>, vector<32x128xf32> -> vector<32x128xf32>
    %c0_3 = arith.constant 0 : index
    %c0_4 = arith.constant 0 : index
    %8 = vector.load %arg3[%c0_3, %c0_4] : memref<32x128xf32, #tpu.memory_space<vmem>>, vector<32x128xf32>
    tpu.vector_store %arg3[%c0_3, %c0_4], %7 {strides = array<i32>} : memref<32x128xf32, #tpu.memory_space<vmem>>, vector<32x128xf32>,
    return
  }
  func.func @transform_0(%arg0: i32) -> (i32, i32) {
    %c0_i32 = arith.constant 0 : i32
    %c0_i32_0 = arith.constant 0 : i32
    return %arg0, %c0_i32 : i32, i32
  }
  func.func @transform_1(%arg0: i32) -> (i32, i32) {
    %c0_i32 = arith.constant 0 : i32
    %c0_i32_0 = arith.constant 0 : i32
    %c0_i32_1 = arith.constant 0 : i32
    return %c0_i32, %c0_i32_0 : i32, i32
  }
  func.func @transform_2(%arg0: i32) -> (i32, i32) {
    %c0_i32 = arith.constant 0 : i32
    %c0_i32_0 = arith.constant 0 : i32
    return %c0_i32, %arg0 : i32, i32
  }
}

</mosaic_0001>

<bundles_post_ra>
// kernel: pallas_embedding.1
= control target key start
LH: loop header
LB: loop body
LE: loop exit
PB: predicated region body
PF: predicated region fallthrough
CT: control target
= control target key end

     0   :  { %7 = vsyncpa [#allocation3], 0  ;;  %s281_s9 = smov [#allocation2]   ;;  %s331_s0 = inlined_call_operand.vmem [shape: s32[1,128], index: 0, kind: input, shape index: {}]   ;;  %s332_s1 = inlined_call_operand.hbm [shape: f32[32,64], index: 1, kind: input, shape index: {}]   ;;  %s333_s2 = inlined_call_operand.vmem [shape: f32[32,128], index: 2, kind: output, shape index: {}]  }
   0x1   :  { %s15_s10 = sshll.u32 %s281_s9, 4  ;;  %s257_s13 = scalar_lea.hbm %s332_s1, 512  ;;  %s16_s10 = int_to_ptr.vmem [resolvable:$true] %s15_s10 }
   0x2   :  { %p258_p0 = scmp.ne.s32.totalorder %s332_s1, %s257_s13  ;;  %p261_p1 = scmp.lt.u32.totalorder %s257_s13, %s332_s1 }
   0x4   :  { %p263_p2 = pnand %p261_p1, %p258_p0 }
   0x6   :  { %266 = shalt.err (!%p263_p2)
}
   0x7   :  { %s267_s18 = scalar_lea.vmem %s16_s10, 512  ;;  %p272_p4 = scmp.lt.s32.totalorder %s16_s10, %s16_s10 }
   0x8   :  { %p268_p3 = scmp.ne.s32.totalorder %s16_s10, %s267_s18  ;;  %p273_p5 = scmp.lt.s32.totalorder %s267_s18, %s267_s18 }
   0xa   :  { %p274_p6 = por %p273_p5, %p272_p4 }
   0xc   :  { %p275_p7 = pnand %p274_p6, %p268_p3 }
   0xe   :  { %278 = shalt.err (!%p275_p7)
}
   0xf   :  { %s282_s19 = smov 128   ;;  %s283_s20 = smov 8  }
  0x10   :  { %21 = dma.hbm_to_vmem [thread:$0]  %s332_s1, 512, %s16_s10, [#allocation3], %s282_s19, %s282_s19, %s283_s20  }
  0x11   :  { %279 = dma.done.wait [#allocation3], 512  }
  0x12   :  { %280 = vsyncadd [#allocation3], 4294966784  ;;  %v30_v0 = vlaneseq  ;;  %vm67_vm0 = vcmask 523264   ;;  %v174_v7 = vld [vmem:[%s331_s0] ss:$0 sm:$0xff]  ;;  %v28_v9 = vld [vmem:[#allocation2 + $0x10] sm:$0xff] }
  0x13   :  { %v26_v8 = vld [vmem:[#allocation2] sm:$0xff]  ;;  %226 = vmatprep.mubr.msk.f32.mxu1 %vm67_vm0, %v28_v9  ;;  %v284_v10 = vmov 1.0|1.0   ;;  %v27_v13 = vld [vmem:[#allocation2 + $0x8] sm:$0xff]  ;;  %v29_v14 = vld [vmem:[#allocation2 + $0x18] sm:$0xff] }
  0x14   :  { %v31_v1 = vshrl.u32 %v30_v0, 7  ;;  %223 = vmatprep.mubr.msk.f32.mxu0 %vm67_vm0, %v26_v8 }
  0x16   :  { %v32_v2 = vadd.s32 8, %v31_v1  ;;  %v33_v3 = vadd.s32 16, %v31_v1  ;;  %v34_v4 = vadd.s32 24, %v31_v1  ;;  %v35_v5 = vadd.s32 32, %v31_v1 }
  0x17   :  { %v36_v6 = vadd.s32 40, %v31_v1  ;;  %vm43_vm1 = vcmp.eq.s32.totalorder %v31_v1, %v174_v7  ;;  %v37_v11 = vadd.s32 48, %v31_v1  ;;  %v38_v12 = vadd.s32 56, %v31_v1 }
  0x18   :  { %vm44_vm2 = vcmp.eq.s32.totalorder %v32_v2, %v174_v7  ;;  %vm45_vm3 = vcmp.eq.s32.totalorder %v33_v3, %v174_v7  ;;  %vm46_vm4 = vcmp.eq.s32.totalorder %v34_v4, %v174_v7  ;;  %vm47_vm7 = vcmp.eq.s32.totalorder %v35_v5, %v174_v7 }
  0x19   :  { %vm229_vm5 = vmpackc.low %vm44_vm2, %vm43_vm1  ;;  %vm48_vm8 = vcmp.eq.s32.totalorder %v36_v6, %v174_v7  ;;  %vm49_vm10 = vcmp.eq.s32.totalorder %v37_v11, %v174_v7  ;;  %vm50_vm11 = vcmp.eq.s32.totalorder %v38_v12, %v174_v7 }
  0x1a   :  { %230 = vmatprep.subr.msk.bf16.mxu0 %vm229_vm5, %v284_v10  ;;  %245 = vmatprep.subr.msk.bf16.mxu1 %vm229_vm5, %v284_v10  ;;  %vm233_vm6 = vmpackc.low %vm46_vm4, %vm45_vm3 }
  0x1b   :  { %232 = vmatpush3.bf16.msk.msra.mxu0 %vm229_vm5, %v284_v10  ;;  %249 = vmatpush3.bf16.msk.msra.mxu1 %vm229_vm5, %v284_v10  ;;  %vm237_vm9 = vmpackc.low %vm48_vm8, %vm47_vm7 }
  0x1c   :  { %234 = vmatprep.subr.msk.bf16.mxu0 %vm233_vm6, %v284_v10  ;;  %246 = vmatprep.subr.msk.bf16.mxu1 %vm233_vm6, %v284_v10  ;;  %vm241_vm12 = vmpackc.low %vm50_vm11, %vm49_vm10 }
  0x1f   :  { %236 = vmatpush3.bf16.msk.msra.mxu0 %vm233_vm6, %v284_v10  ;;  %250 = vmatpush3.bf16.msk.msra.mxu1 %vm233_vm6, %v284_v10 }
  0x20   :  { %238 = vmatprep.subr.msk.bf16.mxu0 %vm237_vm9, %v284_v10  ;;  %247 = vmatprep.subr.msk.bf16.mxu1 %vm237_vm9, %v284_v10 }
  0x23   :  { %240 = vmatpush3.bf16.msk.msra.mxu0 %vm237_vm9, %v284_v10  ;;  %251 = vmatpush3.bf16.msk.msra.mxu1 %vm237_vm9, %v284_v10 }
  0x24   :  { %242 = vmatprep.subr.msk.bf16.mxu0 %vm241_vm12, %v284_v10  ;;  %248 = vmatprep.subr.msk.bf16.mxu1 %vm241_vm12, %v284_v10 }
  0x27   :  { %244 = vmatpush3.bf16.msk.msra.mxu0 %vm241_vm12, %v284_v10  ;;  %252 = vmatpush3.bf16.msk.msra.mxu1 %vm241_vm12, %v284_v10 }
  0x2a   :  { %224 = vmatmul.mubr.msk.f32.vlgmr.msra.gmra.mrb[0].mxu0 %vm67_vm0, %v27_v13  ;;  %227 = vmatmul.mubr.msk.f32.vlgmr.msra.gmra.mrb[0].mxu1 %vm67_vm0, %v29_v14 }
  0xfd   :  { %v225_v15 = vpop.f32.mrb[0].mxu0  ;;  %v228_v16 = vpop.f32.mrb[0].mxu1 }
  0xfe   :  { %166 = vst [vmem:[%s333_s2 + $0x8] sm:$0xff] %v225_v15  ;;  %168 = vst [vmem:[%s333_s2 + $0x18] sm:$0xff] %v228_v16  ;;  %v146_v17 = vpop.f32.mrb[1].mxu0  ;;  %v156_v18 = vpop.f32.mrb[1].mxu1 }
  0xff   :  { %165 = vst [vmem:[%s333_s2] sm:$0xff] %v146_v17  ;;  %167 = vst [vmem:[%s333_s2 + $0x10] sm:$0xff] %v156_v18 }
 0x100   :  { %173 = vsyncpa [#allocation3], 1 }

</bundles_post_ra>
